<compile_context>
chip_gen: v7x
topology: tpu7x:2x2x1
jax: 0.10.0
libtpu: 0.0.40
codegen_flags: <defaults>
</compile_context>

<pallas_src>
import functools
import math

import jax
import jax.numpy as jnp
from jax.experimental import pallas as pl
from jax.experimental.pallas import tpu as pltpu

_LANES = 128
_SUBLANES = 8
_VMEM_BUDGET = 12 * 1024 * 1024   # working-set target; fits every generation's scoped default
_VMEM_LIMIT = 32 * 1024 * 1024    # explicit scoped-VMEM limit handed to Mosaic


def _round_up(x, m):
    return (x + m - 1) // m * m


def _floor_to(x, m):
    return max(m, x // m * m)


def _pick_row_tile(rows, cap):
    """8-aligned row tile <= cap, aiming for >= 2 tiles (megacore) when rows allow."""
    if rows <= _SUBLANES:
        return rows
    return min(cap, _round_up(pl.cdiv(rows, 2), _SUBLANES))


def _pick_adj_tiles(n_nodes, rhs_width, in_itemsize, out_itemsize):
    """VMEM-budgeted tiles for the (N, N) @ (N, W) contraction."""
    tile_n = _pick_row_tile(n_nodes, 256)
    w_lanes = _round_up(rhs_width, _LANES)        # lane-padded width actually held in VMEM
    out_bytes = max(out_itemsize, 4)
    # If the double-buffered output block + f32 accumulator alone blow the
    # budget (very wide packed RHS), shrink the row tile first.
    while tile_n > _SUBLANES and 3 * tile_n * w_lanes * out_bytes > _VMEM_BUDGET:
        tile_n = _floor_to(tile_n // 2, _SUBLANES)
    fixed = 2 * tile_n * w_lanes * out_bytes      # output block, double-buffered
    fixed += tile_n * w_lanes * 4                 # f32 accumulator scratch
    fixed += 2 * _SUBLANES * w_lanes * 4          # bias block (tiny)
    per_k = 2 * in_itemsize * (tile_n + w_lanes)  # adj + rhs blocks, double-buffered
    tile_k = max(0, (_VMEM_BUDGET - fixed) // max(per_k, 1))
    if tile_k >= n_nodes:
        tile_k = n_nodes                          # single K step; full dim is always legal
    else:
        tile_k = _floor_to(tile_k, _LANES)        # last-dim blocks must be 128-aligned
    return tile_n, tile_k


def _pick_feature_tile(rows, c_in, c_pad, in_itemsize, out_itemsize):
    """Row tile for the (rows, C_in) @ (C_in, C_pad) feature matmul."""
    if rows <= _SUBLANES:
        return rows
    tile_m = _pick_row_tile(rows, 512)
    # TODO(synk): K-tile over C_in (like the adjacency kernel) if the resident
    # weight itself approaches the VMEM budget; not needed at GCN-layer sizes.
    fixed = 2 * in_itemsize * c_in * c_pad                       # resident weight
    per_m = (2 * in_itemsize * _round_up(c_in, _LANES)
             + 2 * max(out_itemsize, 4) * c_pad)
    cap = _floor_to(max(_SUBLANES, (_VMEM_BUDGET - fixed) // max(per_m, 1)), _SUBLANES)
    return min(tile_m, cap)


# ---------------------------------------------------------------------------
# Kernels
# ---------------------------------------------------------------------------

def _adj_matmul_kernel(*refs, has_bias, n_nodes, tile_k):
    """One (row-tile, K-tile) grid step of  out = adj @ rhs (+ bias)."""
    if has_bias:
        adj_ref, rhs_ref, bias_ref, o_ref, acc_ref = refs
    else:
        adj_ref, rhs_ref, o_ref, acc_ref = refs
        bias_ref = None

    k = pl.program_id(1)

    @pl.when(k == 0)
    def _init():
        acc_ref[...] = jnp.zeros_like(acc_ref)

    adj_blk = adj_ref[...]          # (tile_n, tile_k)
    rhs_blk = rhs_ref[...]          # (tile_k, W)  -- W = batch*channels packed into lanes

    if n_nodes % tile_k != 0:
        # Ragged tail of the contraction: zero both operands' out-of-range
        # slices so out-of-bounds garbage can never reach the accumulator.
        k0 = k * tile_k
        col = jax.lax.broadcasted_iota(jnp.int32, adj_blk.shape, 1) + k0
        adj_blk = jnp.where(col < n_nodes, adj_blk, jnp.zeros_like(adj_blk))
        row = jax.lax.broadcasted_iota(jnp.int32, rhs_blk.shape, 0) + k0
        rhs_blk = jnp.where(row < n_nodes, rhs_blk, jnp.zeros_like(rhs_blk))

    # Single MXU pass per step: the batch is packed into the RHS lanes, so the
    # adjacency tile goes through the systolic array once, not B times.
    acc_ref[...] += jnp.dot(adj_blk, rhs_blk, preferred_element_type=jnp.float32)

    @pl.when(k == pl.num_programs(1) - 1)
    def _finalize():
        out = acc_ref[...]
        if has_bias:
            out = out + bias_ref[...]          # one add over the whole block
        o_ref[...] = out.astype(o_ref.dtype)


def _feature_matmul_kernel(*refs, has_bias):
    """One row-tile grid step of  out = x @ W (+ bias)."""
    if has_bias:
        x_ref, w_ref, bias_ref, o_ref = refs
    else:
        x_ref, w_ref, o_ref = refs
        bias_ref = None
    out = jnp.dot(x_ref[...], w_ref[...], preferred_element_type=jnp.float32)
    if has_bias:
        out = out + bias_ref[...]
    o_ref[...] = out.astype(o_ref.dtype)


# ---------------------------------------------------------------------------
# pallas_call wrappers
# ---------------------------------------------------------------------------

def _adj_matmul(adj, rhs, bias_packed, out_dtype):
    """out = adj @ rhs (+ bias_packed).  adj: (N, N), rhs: (N, W) batch-packed."""
    n_nodes, w_rhs = rhs.shape
    tile_n, tile_k = _pick_adj_tiles(
        n_nodes, w_rhs,
        jnp.dtype(adj.dtype).itemsize, jnp.dtype(out_dtype).itemsize)
    has_bias = bias_packed is not None

    grid = (pl.cdiv(n_nodes, tile_n), pl.cdiv(n_nodes, tile_k))
    in_specs = [
        pl.BlockSpec((tile_n, tile_k), lambda i, k: (i, k)),   # adj row/col block
        pl.BlockSpec((tile_k, w_rhs), lambda i, k: (k, 0)),    # packed features, K-tiled
    ]
    inputs = [adj, rhs]
    if has_bias:
        in_specs.append(pl.BlockSpec((1, w_rhs), lambda i, k: (0, 0)))
        inputs.append(bias_packed)

    kernel = functools.partial(_adj_matmul_kernel, has_bias=has_bias,
                               n_nodes=n_nodes, tile_k=tile_k)
    return pl.pallas_call(
        kernel,
        out_shape=jax.ShapeDtypeStruct((n_nodes, w_rhs), out_dtype),
        grid_spec=pltpu.PrefetchScalarGridSpec(
            num_scalar_prefetch=0,
            grid=grid,
            in_specs=in_specs,
            out_specs=pl.BlockSpec((tile_n, w_rhs), lambda i, k: (i, 0)),
            scratch_shapes=[pltpu.VMEM((tile_n, w_rhs), jnp.float32)]),
        compiler_params=pltpu.CompilerParams(
            dimension_semantics=("parallel", "arbitrary"),
            vmem_limit_bytes=_VMEM_LIMIT),
    )(*inputs)


def _feature_matmul(x2d, w_p, bias_p, out_dtype):
    """out = x2d @ w_p (+ bias_p).  x2d: (M, C_in), w_p: (C_in, C_pad)."""
    m_rows, c_in = x2d.shape
    c_pad = w_p.shape[1]
    tile_m = _pick_feature_tile(
        m_rows, c_in, c_pad,
        jnp.dtype(x2d.dtype).itemsize, jnp.dtype(out_dtype).itemsize)
    has_bias = bias_p is not None

    in_specs = [
        pl.BlockSpec((tile_m, c_in), lambda i: (i, 0)),
        pl.BlockSpec((c_in, c_pad), lambda i: (0, 0)),          # weight resident
    ]
    inputs = [x2d, w_p]
    if has_bias:
        in_specs.append(pl.BlockSpec((1, c_pad), lambda i: (0, 0)))
        inputs.append(bias_p)

    kernel = functools.partial(_feature_matmul_kernel, has_bias=has_bias)
    return pl.pallas_call(
        kernel,
        out_shape=jax.ShapeDtypeStruct((m_rows, c_pad), out_dtype),
        grid_spec=pltpu.PrefetchScalarGridSpec(
            num_scalar_prefetch=0,
            grid=(pl.cdiv(m_rows, tile_m),),
            in_specs=in_specs,
            out_specs=pl.BlockSpec((tile_m, c_pad), lambda i: (i, 0))),
        compiler_params=pltpu.CompilerParams(
            dimension_semantics=("parallel",),
            vmem_limit_bytes=_VMEM_LIMIT),
    )(*inputs)


# ---------------------------------------------------------------------------
# Public entry point
# ---------------------------------------------------------------------------

def graph_convolution(x, weight, adj, bias=None, *, compute_dtype=None):
    """GCN layer forward: adj @ (x @ weight) + bias.

    x: (B, N, C_in), weight: (C_in, C_out), adj: (N, N), bias: (C_out,) | None.
    compute_dtype: optional MXU input dtype (jnp.bfloat16 on v6e/v7x for ~2x
    MXU throughput and half the HBM/VMEM bytes); accumulation is always f32.
    """
    batch, n_nodes, c_in = x.shape
    assert weight.shape[0] == c_in
    c_out = weight.shape[1]
    assert adj.shape == (n_nodes, n_nodes)

    out_dtype = x.dtype
    cdt = jnp.dtype(compute_dtype) if compute_dtype is not None else jnp.dtype(x.dtype)

    # Lane-pad output channels so final stores are unmasked full-lane vst.
    c_pad = _round_up(c_out, _LANES)
    if c_pad == c_out:
        w_p = weight.astype(cdt)
    else:
        w_p = jnp.zeros((c_in, c_pad), cdt).at[:, :c_out].set(weight.astype(cdt))

    has_bias = bias is not None
    bias_f32 = None
    if has_bias:
        bias_f32 = jnp.zeros((c_pad,), jnp.float32).at[:c_out].set(bias.astype(jnp.float32))

    adj_c = adj.astype(cdt)

    # Run the dominant N x N contraction at the narrower of the two channel
    # widths that actually hit the MXU (the *padded* output width).
    adj_first = c_in <= c_pad

    if adj_first:
        # h = adj @ x at width C_in (batch lane-packed -> one adj MXU pass),
        # then exactly one feature matmul (h @ W) + bias over all B*N rows.
        x_packed = (jnp.transpose(x, (1, 0, 2))
                    .reshape(n_nodes, batch * c_in).astype(cdt))
        h_packed = _adj_matmul(adj_c, x_packed, None, cdt)               # (N, B*C_in)
        h2d = (h_packed.reshape(n_nodes, batch, c_in)
               .transpose(1, 0, 2).reshape(batch * n_nodes, c_in))
        bias_p = bias_f32.reshape(1, c_pad) if has_bias else None
        out2d = _feature_matmul(h2d, w_p, bias_p, out_dtype)             # (B*N, C_pad)
        out = out2d.reshape(batch, n_nodes, c_pad)
    else:
        # support = x @ W computed exactly once (never per adj row tile), then
        # the N x N contraction at width C_pad with the batch lane-packed.
        x2d = x.reshape(batch * n_nodes, c_in).astype(cdt)
        support2d = _feature_matmul(x2d, w_p, None, cdt)                 # (B*N, C_pad)
        support_packed = (support2d.reshape(batch, n_nodes, c_pad)
                          .transpose(1, 0, 2).reshape(n_nodes, batch * c_pad))
        bias_packed = (jnp.tile(bias_f32, batch).reshape(1, batch * c_pad)
                       if has_bias else None)
        out_packed = _adj_matmul(adj_c, support_packed, bias_packed, out_dtype)
        out = out_packed.reshape(n_nodes, batch, c_pad).transpose(1, 0, 2)

    if c_pad != c_out:
        out = out[:, :, :c_out]
    return out


def reference(x, weight, adj, bias):
    support = jnp.einsum("bnc,co->bno", x, weight)
    out = jnp.einsum("nm,bmo->bno", adj, support)
    if bias is not None:
        out = out + bias
    return out


if __name__ == "__main__":
    key = jax.random.PRNGKey(0)
    k_x, k_w, k_b, k_a, k_x2, k_w2, k_b2 = jax.random.split(key, 7)

    # Small shapes consistent with the module: B batches of N nodes, C_in -> C_out.
    B, N, C_in, C_out = 2, 16, 8, 32

    # Deterministic parameter init mirroring reset_parameters():
    # uniform(-stdv, stdv) with stdv = 1/sqrt(out_features).
    stdv = 1.0 / math.sqrt(C_out)
    weight = jax.random.uniform(k_w, (C_in, C_out), jnp.float32, -stdv, stdv)
    bias = jax.random.uniform(k_b, (C_out,), jnp.float32, -stdv, stdv)

    # TODO(synk): the real module loads adj from a .npy file (mat_path); a
    # symmetric row-normalized adjacency is synthesized deterministically here.
    a = jax.random.uniform(k_a, (N, N), jnp.float32)
    a = (a + a.T) * 0.5 + jnp.eye(N, dtype=jnp.float32)
    adj = a / jnp.sum(a, axis=1, keepdims=True)

    x = jax.random.normal(k_x, (B, N, C_in), jnp.float32)

    gcn = jax.jit(graph_convolution, static_argnames=("compute_dtype",))

    # 1) adjacency-first path (C_in <= padded C_out), with bias.
    out = jax.block_until_ready(gcn(x, weight, adj, bias))
    ref = reference(x, weight, adj, bias)
    assert out.shape == (B, N, C_out)
    assert jnp.allclose(out, ref, atol=1e-4, rtol=1e-4), "adj-first path mismatch"

    # 2) No-bias path.
    out_nb = jax.block_until_ready(gcn(x, weight, adj, None))
    assert jnp.allclose(out_nb, reference(x, weight, adj, None),
                        atol=1e-4, rtol=1e-4), "no-bias path mismatch"

    # 3) support-first path (C_in > padded C_out).
    C_in2 = 160
    w2 = jax.random.uniform(k_w2, (C_in2, C_out), jnp.float32, -stdv, stdv)
    b2 = jax.random.uniform(k_b2, (C_out,), jnp.float32, -stdv, stdv)
    x2 = jax.random.normal(k_x2, (B, N, C_in2), jnp.float32)
    out2 = jax.block_until_ready(gcn(x2, w2, adj, b2))
    assert jnp.allclose(out2, reference(x2, w2, adj, b2),
                        atol=1e-4, rtol=1e-4), "support-first path mismatch"

    # 4) bf16 MXU path (v6e/v7x): bf16 inputs, f32 accumulation.
    out_bf = jax.block_until_ready(gcn(x, weight, adj, bias,
                                       compute_dtype=jnp.bfloat16))
    assert jnp.allclose(out_bf, ref, atol=3e-2, rtol=3e-2), "bf16 path mismatch"

    print("KERNEL_OK")
</pallas_src>

<mosaic_0001>
module attributes {stable_mosaic.version = 11 : i64} {
  func.func @_adj_matmul_kernel(%arg0: i32, %arg1: i32, %arg2: memref<8x16xf32, #tpu.memory_space<vmem>>, %arg3: memref<16x16xf32, #tpu.memory_space<vmem>>, %arg4: memref<8x16xf32, #tpu.memory_space<vmem>>, %arg5: memref<8x16xf32, #tpu.memory_space<vmem>>) attributes {dimension_semantics = [#tpu.dimension_semantics<parallel>, #tpu.dimension_semantics<arbitrary>], iteration_bounds = array<i64: 2, 1>, scalar_prefetch = 0 : i64, scratch_operands = 1 : i64, tpu.core_type = #tpu.core_type<tc>, window_params = [{transform_indices = @transform_0, window_bounds = array<i64: 8, 16>}, {transform_indices = @transform_1, window_bounds = array<i64: 16, 16>}, {transform_indices = @transform_2, window_bounds = array<i64: 8, 16>}]} {
    %c0_i32 = arith.constant 0 : i32
    %0 = arith.cmpi eq, %arg1, %c0_i32 : i32
    %1 = arith.extui %0 : i1 to i32
    %c0_i32_0 = arith.constant 0 : i32
    %2 = arith.cmpi ne, %1, %c0_i32_0 : i32
    scf.if %2 {
      %cst_10 = arith.constant 0.000000e+00 : f32
      %12 = vector.broadcast %cst_10 : f32 to vector<8x16xf32>
      %c0_11 = arith.constant 0 : index
      %c0_12 = arith.constant 0 : index
      %13 = vector.load %arg5[%c0_11, %c0_12] : memref<8x16xf32, #tpu.memory_space<vmem>>, vector<8x16xf32>
      tpu.vector_store %arg5[%c0_11, %c0_12], %12 {strides = array<i32>} : memref<8x16xf32, #tpu.memory_space<vmem>>, vector<8x16xf32>,
    } else {
    }
    %c0 = arith.constant 0 : index
    %c0_1 = arith.constant 0 : index
    %3 = vector.load %arg2[%c0, %c0_1] : memref<8x16xf32, #tpu.memory_space<vmem>>, vector<8x16xf32>
    %c0_2 = arith.constant 0 : index
    %c0_3 = arith.constant 0 : index
    %4 = vector.load %arg3[%c0_2, %c0_3] : memref<16x16xf32, #tpu.memory_space<vmem>>, vector<16x16xf32>
    %c0_4 = arith.constant 0 : index
    %c0_5 = arith.constant 0 : index
    %5 = vector.load %arg5[%c0_4, %c0_5] : memref<8x16xf32, #tpu.memory_space<vmem>>, vector<8x16xf32>
    %cst = arith.constant dense<0.000000e+00> : vector<8x16xf32>
    %6 = tpu.matmul %3, %4, %cst {dimension_numbers = #tpu.dot_dimension_numbers<[1], [0], [0], [1], [0, 0, 1, 1], [], []>} : vector<8x16xf32>, vector<16x16xf32>, vector<8x16xf32> -> vector<8x16xf32>
    %7 = arith.addf %5, %6 : vector<8x16xf32>
    %c0_6 = arith.constant 0 : index
    %c0_7 = arith.constant 0 : index
    %8 = vector.load %arg5[%c0_6, %c0_7] : memref<8x16xf32, #tpu.memory_space<vmem>>, vector<8x16xf32>
    tpu.vector_store %arg5[%c0_6, %c0_7], %7 {strides = array<i32>} : memref<8x16xf32, #tpu.memory_space<vmem>>, vector<8x16xf32>,
    %c0_i32_8 = arith.constant 0 : i32
    %9 = arith.cmpi eq, %arg1, %c0_i32_8 : i32
    %10 = arith.extui %9 : i1 to i32
    %c0_i32_9 = arith.constant 0 : i32
    %11 = arith.cmpi ne, %10, %c0_i32_9 : i32
    scf.if %11 {
      %c0_10 = arith.constant 0 : index
      %c0_11 = arith.constant 0 : index
      %12 = vector.load %arg5[%c0_10, %c0_11] : memref<8x16xf32, #tpu.memory_space<vmem>>, vector<8x16xf32>
      %c0_12 = arith.constant 0 : index
      %c0_13 = arith.constant 0 : index
      %13 = vector.load %arg4[%c0_12, %c0_13] : memref<8x16xf32, #tpu.memory_space<vmem>>, vector<8x16xf32>
      tpu.vector_store %arg4[%c0_12, %c0_13], %12 {strides = array<i32>} : memref<8x16xf32, #tpu.memory_space<vmem>>, vector<8x16xf32>,
    } else {
    }
    return
  }
  func.func @transform_0(%arg0: i32, %arg1: i32) -> (i32, i32) {
    %c0_i32 = arith.constant 0 : i32
    return %arg0, %arg1 : i32, i32
  }
  func.func @transform_1(%arg0: i32, %arg1: i32) -> (i32, i32) {
    %c0_i32 = arith.constant 0 : i32
    %c0_i32_0 = arith.constant 0 : i32
    return %arg1, %c0_i32 : i32, i32
  }
  func.func @transform_2(%arg0: i32, %arg1: i32) -> (i32, i32) {
    %c0_i32 = arith.constant 0 : i32
    %c0_i32_0 = arith.constant 0 : i32
    return %arg0, %c0_i32 : i32, i32
  }
}

module attributes {stable_mosaic.version = 11 : i64} {
  func.func @_feature_matmul_kernel(%arg0: i32, %arg1: memref<16x8xf32, #tpu.memory_space<vmem>>, %arg2: memref<8x128xf32, #tpu.memory_space<vmem>>, %arg3: memref<1x128xf32, #tpu.memory_space<vmem>>, %arg4: memref<16x128xf32, #tpu.memory_space<vmem>>) attributes {dimension_semantics = [#tpu.dimension_semantics<parallel>], iteration_bounds = array<i64: 2>, scalar_prefetch = 0 : i64, scratch_operands = 0 : i64, tpu.core_type = #tpu.core_type<tc>, window_params = [{transform_indices = @transform_0, window_bounds = array<i64: 16, 8>}, {pipeline_mode = #tpu.pipeline_mode<synchronous>, transform_indices = @transform_1, window_bounds = array<i64: 8, 128>}, {pipeline_mode = #tpu.pipeline_mode<synchronous>, transform_indices = @transform_2, window_bounds = array<i64: 1, 128>}, {transform_indices = @transform_3, window_bounds = array<i64: 16, 128>}]} {
    %c0 = arith.constant 0 : index
    %c0_0 = arith.constant 0 : index
    %0 = vector.load %arg1[%c0, %c0_0] : memref<16x8xf32, #tpu.memory_space<vmem>>, vector<16x8xf32>
    %c0_1 = arith.constant 0 : index
    %c0_2 = arith.constant 0 : index
    %1 = vector.load %arg2[%c0_1, %c0_2] : memref<8x128xf32, #tpu.memory_space<vmem>>, vector<8x128xf32>
    %cst = arith.constant dense<0.000000e+00> : vector<16x128xf32>
    %2 = tpu.matmul %0, %1, %cst {dimension_numbers = #tpu.dot_dimension_numbers<[1], [0], [0], [1], [0, 0, 1, 1], [], []>} : vector<16x8xf32>, vector<8x128xf32>, vector<16x128xf32> -> vector<16x128xf32>
    %c0_3 = arith.constant 0 : index
    %c0_4 = arith.constant 0 : index
    %3 = vector.load %arg3[%c0_3, %c0_4] : memref<1x128xf32, #tpu.memory_space<vmem>>, vector<1x128xf32>
    %4 = vector.broadcast %3 : vector<1x128xf32> to vector<16x128xf32>
    %5 = arith.addf %2, %4 : vector<16x128xf32>
    %c0_5 = arith.constant 0 : index
    %c0_6 = arith.constant 0 : index
    %6 = vector.load %arg4[%c0_5, %c0_6] : memref<16x128xf32, #tpu.memory_space<vmem>>, vector<16x128xf32>
    tpu.vector_store %arg4[%c0_5, %c0_6], %5 {strides = array<i32>} : memref<16x128xf32, #tpu.memory_space<vmem>>, vector<16x128xf32>,
    return
  }
  func.func @transform_0(%arg0: i32) -> (i32, i32) {
    %c0_i32 = arith.constant 0 : i32
    %c0_i32_0 = arith.constant 0 : i32
    return %arg0, %c0_i32 : i32, i32
  }
  func.func @transform_1(%arg0: i32) -> (i32, i32) {
    %c0_i32 = arith.constant 0 : i32
    %c0_i32_0 = arith.constant 0 : i32
    %c0_i32_1 = arith.constant 0 : i32
    return %c0_i32, %c0_i32_0 : i32, i32
  }
  func.func @transform_2(%arg0: i32) -> (i32, i32) {
    %c0_i32 = arith.constant 0 : i32
    %c0_i32_0 = arith.constant 0 : i32
    %c0_i32_1 = arith.constant 0 : i32
    return %c0_i32, %c0_i32_0 : i32, i32
  }
  func.func @transform_3(%arg0: i32) -> (i32, i32) {
    %c0_i32 = arith.constant 0 : i32
    %c0_i32_0 = arith.constant 0 : i32
    return %arg0, %c0_i32 : i32, i32
  }
}

</mosaic_0001>

<bundles_post_ra>
// kernel: graph_convolution.2
= control target key start
LH: loop header
LB: loop body
LE: loop exit
PB: predicated region body
PF: predicated region fallthrough
CT: control target
= control target key end

     0   :  { %s448_s9 = smov 0   ;;  %s450_s10 = smov 0   ;;  %s491_s0 = inlined_call_operand.vmem [shape: f32[16,16], index: 0, kind: input, shape index: {}]   ;;  %s492_s1 = inlined_call_operand.vmem [shape: f32[16,16], index: 1, kind: input, shape index: {}]   ;;  %s493_s2 = inlined_call_operand.vmem [shape: f32[16,16], index: 2, kind: output, shape index: {}]  }
   0x1   :  { %s452_s11 = smov 0  }
   0x2 LB: > { %s24_s12 = sadd.s32 1, %s424_s10  ;;  %p360_p0 = scmp.ge.s32.totalorder %s428_s11, 1  ;;  %s428_s11 = sphi %s452_s11, %s12_s11   ;;  %s424_s10 = sphi %s450_s10, %s495_s10   ;;  %s420_s9 = sphi %s448_s9, %s494_s9  }
   0x3   : > { %p26_p1 = scmp.ge.s32.totalorder %s24_s12, 2  ;;  %p139_p2 = scmp.lt.s32.totalorder %s428_s11, 3 }
   0x5   : > { %s497_s12 = smov (%p26_p1, %s24_s12), 0  ;;  %p140_p3 = pnand %p360_p0, %p139_p2 }
   0x6   : > { %v191_v0 = vld [vmem:[%s492_s1] sm:$0xff] (!%p140_p3)  ;;  %v192_v1 = vld [vmem:[%s492_s1 + $0x8] sm:$0xff] (!%p140_p3)  ;;  %vm188_vm0 = vcmask (!%p140_p3), 130048   ;;  %v430_v2 = vmov (!%p140_p3), 0.0|0.0   ;;  %v431_v4 = vmov (!%p140_p3), 0.0   ;;  %vm432_vm1 = vmmov (!%p140_p3), 0  }
   0x7   : > { %143 = sbr.rel (%p140_p3) target bundleno = 241 (0xf1), region = 28  ;;  %376 = vmatprep.subr.bf16.mxu0 (!%p140_p3), %v430_v2  ;;  %v377_v3 = vpack.c.bf16 (!%p140_p3), %v192_v1, %v191_v0  ;;  %189 = vst.msk [vmem:[#allocation2] sm:$0xff] (!%p140_p3), %vm188_vm0, %v431_v4  ;;  %373 = vmatprep.mubr.msk.f32.mxu0 (!%p140_p3), %vm432_vm1, %v431_v4  ;;  %p167_p4 = scmp.lt.s32.totalorder (!%p140_p3), %s420_s9, 1 }
   0x9   : > { %378 = vmatpush3.bf16.msra.mxu0 (!%p140_p3), %v377_v3 }
   0xe   : > { %s499_s9 = smov (!%p167_p4, %s420_s9), 1  ;;  %v193_v6 = vld [vmem:[#allocation2] sm:$0xff] }
   0xf   : > { %s361_s17 = sshll.u32 %s499_s9, 3 }
  0x10   : > { %s173_s20 = scalar_lea.vmem %s491_s0, %s361_s17  ;;  %s183_s23 = scalar_lea.vmem %s493_s2, %s361_s17 }
  0x11   : > { %v190_v5 = vld [vmem:[%s173_s20] sm:$0xff] }
  0x12   : > { %374 = vmatmul.mubr.msk.f32.vlgmr.msra.gmra.mrb[0].mxu0 %vm188_vm0, %v190_v5 }
  0xe5   : > { %v264_v7 = vpop.f32.mrb[0].mxu0 }
  0xe6   : > { %v268_v8 = vadd.f32 %v264_v7, %v193_v6  ;;  %v375_v9 = vpop.f32.mrb[1].mxu0 }
  0xe8   : > { %269 = vst.msk [vmem:[#allocation2] sm:$0xff] %vm188_vm0, %v268_v8 }
  0xef   : > { %v273_v10 = vld [vmem:[#allocation2] sm:$0xff] }
  0xf0   : > { %274 = vst.msk [vmem:[%s183_s23] sm:$0xff] %vm188_vm0, %v273_v10 }
  0xf1 PF: > { %s12_s11 = sadd.s32 1, %s428_s11   ;;  %s494_s9 = smov %s424_s10 }
  0xf2   : > { %p9_p5 = scmp.ge.s32.totalorder %s12_s11, 4   ;;  %s495_s10 = smov %s497_s12 }
  0xf4   :  { %11 = sbr.rel (!%p9_p5) target bundleno = 2 (0x2), region = 69 }

// kernel: graph_convolution.3
= control target key start
LH: loop header
LB: loop body
LE: loop exit
PB: predicated region body
PF: predicated region fallthrough
CT: control target
= control target key end

     0   :  { %8 = vsyncpa [#allocation3], 0  ;;  %s602_s0 = inlined_call_operand.vmem [shape: f32[32,8], index: 0, kind: input, shape index: {}]   ;;  %s603_s1 = inlined_call_operand.vmem [shape: f32[8,128], index: 1, kind: input, shape index: {}]   ;;  %s604_s2 = inlined_call_operand.vmem [shape: f32[1,128], index: 2, kind: input, shape index: {}]   ;;  %s605_s3 = inlined_call_operand.hbm [shape: f32[32,128], index: 3, kind: output, shape index: {}]  }
   0x1   :  { %10 = vsyncpa [#allocation3 + $0x1], 0  ;;  %s494_s12 = smov 0   ;;  %s496_s13 = smov 0  }
   0x2   :  { %s498_s14 = smov 0   ;;  %s500_s15 = smov 0  }
   0x3 LB: > { %s515_s16 = sadd.s32 4294967295, %s469_s15   ;;  %s342_s17 = sadd.s32 4294967294, %s469_s15   ;;  %s469_s15 = sphi %s500_s15, %s611_s15   ;;  %s465_s14 = sphi %s498_s14, %s610_s14   ;;  %s461_s13 = sphi %s496_s13, %s609_s13   ;;  %s457_s12 = sphi %s494_s12, %s608_s12  }
   0x4   : > { %s519_s18 = sadd.s32 1, %s469_s15   ;;  %s91_s19 = sadd.s32 1, %s465_s14 }
   0x5   : > { %s88_s20 = ssub.s32 %s469_s15, %s519_s18  ;;  %p101_p0 = scmp.ne.s32.totalorder %s465_s14, %s461_s13 }
   0x6   : > { %p89_p1 = scmp.eq.s32.totalorder %s88_s20, 0  ;;  %p102_p2 = scmp.eq.s32.totalorder %s515_s16, 1 }
   0x7   : > { %p107_p3 = scmp.ne.s32.totalorder %s461_s13, %s457_s12  ;;  %p108_p4 = scmp.eq.s32.totalorder %s342_s17, 1 }
   0x8   : > { %s530_s21 = scalar_select %p89_p1, %s465_s14, %s91_s19  }
   0x9   : > { %p532_p5 = por %p102_p2, %p101_p0  ;;  %p536_p6 = por %p108_p4, %p107_p3 }
   0xa   : > { %p345_p7 = scmp.ge.s32.totalorder %s469_s15, 1  ;;  %p141_p8 = scmp.lt.s32.totalorder %s469_s15, 3 }
   0xc   : > { %p142_p9 = pnand %p345_p7, %p141_p8 }
   0xd   : > { %v174_v0 = vld [vmem:[%s603_s1] sm:$0xff] (!%p142_p9)  ;;  %s347_s26 = sshll.u32 (!%p142_p9), %s515_s16, 1  ;;  %vm182_vm0 = vcmask (!%p142_p9), 64512   ;;  %s162_s4 = sand.u32 (!%p142_p9), 1, %s461_s13  }
   0xe   : > { %145 = sbr.rel (%p142_p9) target bundleno = 256 (0x100), region = 32  ;;  %361 = vmatprep.subr.mxu0 (!%p142_p9), %v174_v0  ;;  %p166_p10 = scmp.lt.s32.totalorder (!%p142_p9), %s347_s26, 3  ;;  %v349_v3 = vld [vmem:[%s604_s2] ss:$0 sm:$0xff] (!%p142_p9) }
   0xf   : > { %362 = vmatpush3.msra.mxu0 (!%p142_p9), %v174_v0  ;;  %s346_s5 = sshll.u32 (!%p142_p9), %s162_s4, 4  ;;  %s357_s10 = sshll.u32 (!%p142_p9), %s515_s16, 8 }
  0x10   : > { %s164_s8 = scalar_lea.vmem (!%p142_p9), [#allocation2], %s346_s5  ;;  %s559_s19 = scalar_lea.hbm (!%p142_p9), %s605_s3, %s357_s10 }
  0x11   : > { %s280_s9 = sshll.u32 (!%p142_p9), %s164_s8, 4  ;;  %s561_s20 = scalar_lea.sflag (!%p142_p9), [#allocation3], %s162_s4  ;;  %s554_s9 = int_to_ptr.vmem [resolvable:$true] %s280_s9 }
  0x12   : > { %s407_s24 = scalar_lea.vmem (!%p142_p9), %s554_s9, 256  ;;  %s471_s16 = smov (!%p142_p9), [#allocation2]  }
  0x13   : > { %p408_p11 = scmp.ne.s32.totalorder (!%p142_p9), %s554_s9, %s407_s24  ;;  %s411_s25 = sshll.u32 (!%p142_p9), %s471_s16, 4  ;;  %s412_s25 = int_to_ptr.vmem [resolvable:$false] %s411_s25 }
  0x14   : > { %p414_p0 = scmp.lt.s32.totalorder (!%p142_p9), %s554_s9, %s412_s25 }
  0x15   : > { %s613_s26 = smov (!%p166_p10, %s347_s26), 3  ;;  %p409_p12 = pnand %p408_p11, %p532_p5 }
  0x16   : > { %s348_s27 = sshll.u32 %s613_s26, 3  ;;  %s413_s26 = scalar_lea.vmem %s412_s25, 512 }
  0x17   : > { %s169_s30 = scalar_lea.vmem %s602_s0, %s348_s27  ;;  %p410_p13 = pneg %p409_p12 }
  0x18   : > { %v172_v1 = vld [vmem:[%s169_s30] sm:$0xff]  ;;  %v173_v2 = vld [vmem:[%s169_s30 + $0x8] sm:$0xff]  ;;  %p415_p1 = scmp.lt.s32.totalorder %s413_s26, %s407_s24 }
  0x19   : > { %363 = vmatprep.mubr.msk.f32.mxu0 %vm182_vm0, %v172_v1 }
  0x1a   : > { %364 = vmatmul.mubr.msk.f32.vlgmr.msra.gmra.mrb[0].mxu0 %vm182_vm0, %v173_v2  ;;  %p416_p2 = por %p415_p1, %p414_p0 }
  0x1c   : > { %p417_p3 = pnand %p416_p2, %p410_p13 }
  0xed   : > { %v365_v4 = vpop.f32.mrb[0].mxu0 }
  0xee   : > { %v261_v5 = vadd.f32 %v365_v4, %v349_v3  ;;  %v255_v6 = vpop.f32.mrb[1].mxu0 }
  0xef   : > { %v256_v7 = vadd.f32 %v349_v3, %v255_v6 }
  0xf0   : > { %265 = vst [vmem:[%s164_s8 + $0x8] sm:$0xff] %v261_v5 }
  0xf1   : > { %264 = vst [vmem:[%s164_s8] sm:$0xff] %v256_v7 }
  0xf2   : > { %420 = shalt.err (!%p417_p3)
}
  0xf3   : > { %s421_s27 = scalar_lea.hbm %s559_s19, 256  ;;  %s425_s30 = scalar_lea.hbm %s605_s3, 512 }
  0xf4   : > { %p422_p4 = scmp.ne.s32.totalorder %s559_s19, %s421_s27  ;;  %p426_p9 = scmp.lt.u32.totalorder %s559_s19, %s605_s3 }
  0xf5   : > { %p427_p10 = scmp.lt.u32.totalorder %s425_s30, %s421_s27  ;;  %p429_p12 = scmp.lt.u32.totalorder %s421_s27, %s559_s19 }
  0xf6   : > { %p423_p7 = pnand %p422_p4, %p532_p5 }
  0xf7   : > { %p428_p11 = por %p427_p10, %p426_p9 }
  0xf8   : > { %p424_p8 = pneg %p423_p7 }
  0xf9   : > { %p430_p13 = por %p429_p12, %p428_p11 }
  0xfb   : > { %p431_p0 = pnand %p430_p13, %p424_p8 }
  0xfd   : > { %434 = shalt.err (!%p431_p0)
}
  0xfe   : > { %s472_s6 = smov 128   ;;  %s473_s7 = smov 8  }
  0xff   : > { %366 = dma.vmem_to_hbm [thread:$0]  (%p532_p5), %s554_s9, 256, %s559_s19, %s561_s20, %s472_s6, %s472_s6, %s473_s7  }
 0x100 PF: > { %p372_p1 = scmp.ge.s32.totalorder %s469_s15, 2  ;;  %s295_s8 = sand.u32 1, %s457_s12  }
 0x101   : > { %s296_s10 = scalar_lea.sflag [#allocation3], %s295_s8 }
 0x102   : > { %p369_p2 = pnand %p372_p1, %p536_p6 }
 0x104   : > { %452 = dma.done.wait (!%p369_p2), %s296_s10, 256  }
 0x105   : > { %454 = vsyncadd (!%p369_p2), %s296_s10, 4294967040  ;;  %p13_p3 = scmp.ge.s32.totalorder %s519_s18, 4   ;;  %s608_s12 = smov %s461_s13 }
 0x106   : > { %s609_s13 = smov %s465_s14  ;;  %s610_s14 = smov %s530_s21 }
 0x107   : > { %s611_s15 = smov %s519_s18  ;;  %15 = sbr.rel (!%p13_p3) target bundleno = 3 (0x3), region = 67 }
 0x10e   :  { %301 = vsyncpa [#allocation3], 1 }
 0x10f   :  { %303 = vsyncpa [#allocation3 + $0x1], 1 }

</bundles_post_ra>
